<compile_context>
chip_gen: v7x
topology: tpu7x:2x2x1
jax: 0.10.0
libtpu: 0.0.40
codegen_flags: <defaults>
</compile_context>

<pallas_src>
import functools

import jax
import jax.numpy as jnp
from jax.experimental import pallas as pl
from jax.experimental.pallas import tpu as pltpu

BN_EPS = 1e-5

INPUT_DIM = 20
HIDDEN_DIMS = (256, 128)
EMBEDDING_DIM = 128


def _round_up(n, m):
    return (n + m - 1) // m * m


# ---------------------------------------------------------------------------
# Kernel: x @ W1 + b1 -> ReLU -> @ W2' + b2' -> ReLU -> @ W3' + b3'
# (BN already folded into W2'/b2' and W3'/b3'; dropout is identity in eval.)
# ---------------------------------------------------------------------------
def _mlp_kernel(x_ref, w1_ref, b1_ref, w2_ref, b2_ref, w3_ref, b3_ref, out_ref):
    # x arrives in its native f32; the bf16 cast is a cheap VPU op inside the
    # kernel instead of a separate XLA HBM pass in the wrapper.
    x = x_ref[...].astype(w1_ref.dtype)                                # (TB, 20)

    h = jnp.dot(x, w1_ref[...], preferred_element_type=jnp.float32) + b1_ref[...]
    h = jnp.maximum(h, 0.0)

    h = jnp.dot(h.astype(w2_ref.dtype), w2_ref[...],
                preferred_element_type=jnp.float32) + b2_ref[...]
    h = jnp.maximum(h, 0.0)

    out = jnp.dot(h.astype(w3_ref.dtype), w3_ref[...],
                  preferred_element_type=jnp.float32) + b3_ref[...]
    out_ref[...] = out.astype(out_ref.dtype)


# ---------------------------------------------------------------------------
# Parameter prep: fold eval-mode BatchNorm into the next Linear, cast weights
# to bf16 (biases stay f32).
# ---------------------------------------------------------------------------
def fold_params(p, compute_dtype=jnp.bfloat16):
    s1 = p["g1"] * jax.lax.rsqrt(p["v1"] + BN_EPS)        # (1, H1)
    t1 = p["be1"] - p["m1"] * s1                          # (1, H1)
    w2f = p["w2"] * s1.reshape(-1, 1)                     # row-scale (H1, H2)
    b2f = t1 @ p["w2"] + p["b2"]                          # (1, H2)

    s2 = p["g2"] * jax.lax.rsqrt(p["v2"] + BN_EPS)
    t2 = p["be2"] - p["m2"] * s2
    w3f = p["w3"] * s2.reshape(-1, 1)
    b3f = t2 @ p["w3"] + p["b3"]

    return (p["w1"].astype(compute_dtype), p["b1"].astype(jnp.float32),
            w2f.astype(compute_dtype), b2f.astype(jnp.float32),
            w3f.astype(compute_dtype), b3f.astype(jnp.float32))


@functools.partial(jax.jit, static_argnames=("block_b", "out_dtype"))
def patient_embedding_forward(x, params, *, block_b=1024, out_dtype=jnp.float32):
    """Fused MLP forward. x: (B, INPUT_DIM) float32 -> (B, 128) out_dtype."""
    B = x.shape[0]
    H1, H2 = HIDDEN_DIMS
    w1, b1, w2, b2, w3, b3 = fold_params(params, jnp.bfloat16)

    # Batch tile: multiple of 8 sublanes, capped at block_b.  Targets >=2 grid
    # steps whenever B > 8 so the "parallel" batch axis splits across the two
    # TensorCores on v7x (no effect on single-TC v5e/v6e).
    tb = max(8, min(block_b, _round_up(-(-B // 2), 8)))
    grid = (pl.cdiv(B, tb),)   # partial tail block: store is masked; rows are
                               # independent so undefined tail x rows are inert.

    resident = lambda shape: pl.BlockSpec(shape, lambda i: (0, 0))

    out_itemsize = jnp.dtype(out_dtype).itemsize
    weight_bytes = ((w1.size + w2.size + w3.size) * 2
                    + (b1.size + b2.size + b3.size) * 4)
    cost = pl.CostEstimate(
        flops=2 * B * (INPUT_DIM * H1 + H1 * H2 + H2 * EMBEDDING_DIM),
        transcendentals=0,
        bytes_accessed=(x.size * x.dtype.itemsize
                        + B * EMBEDDING_DIM * out_itemsize
                        + weight_bytes),
    )

    compiler_kwargs = dict(dimension_semantics=("parallel",))
    if tb > 2048:
        # v5e's scoped-VMEM default is 16 MiB; only needed for very large tiles.
        compiler_kwargs["vmem_limit_bytes"] = 64 << 20

    out = pl.pallas_call(
        _mlp_kernel,
        out_shape=jax.ShapeDtypeStruct((B, EMBEDDING_DIM), out_dtype),
        grid=grid,
        in_specs=[
            pl.BlockSpec((tb, INPUT_DIM), lambda i: (i, 0)),              # x tile (f32)
            resident((INPUT_DIM, H1)), resident((1, H1)),                 # w1, b1
            resident((H1, H2)),        resident((1, H2)),                 # w2', b2'
            resident((H2, EMBEDDING_DIM)), resident((1, EMBEDDING_DIM)),  # w3', b3'
        ],
        out_specs=pl.BlockSpec((tb, EMBEDDING_DIM), lambda i: (i, 0)),
        compiler_params=pltpu.CompilerParams(**compiler_kwargs),
        cost_estimate=cost,
    )(x, w1, b1, w2, b2, w3, b3)

    return out


# ---------------------------------------------------------------------------
# Init mimicking PyTorch defaults (Linear: U(+-1/sqrt(fan_in)); BN: gamma=1,
# beta=0, running_mean=0, running_var=1). Biases/BN stats stored as (1, N).
# ---------------------------------------------------------------------------
def init_params(key):
    def linear(key, fan_in, fan_out):
        kw, kb = jax.random.split(key)
        bound = 1.0 / jnp.sqrt(float(fan_in))
        w = jax.random.uniform(kw, (fan_in, fan_out), jnp.float32, -bound, bound)
        b = jax.random.uniform(kb, (1, fan_out), jnp.float32, -bound, bound)
        return w, b

    k1, k2, k3 = jax.random.split(key, 3)
    w1, b1 = linear(k1, INPUT_DIM, HIDDEN_DIMS[0])
    w2, b2 = linear(k2, HIDDEN_DIMS[0], HIDDEN_DIMS[1])
    w3, b3 = linear(k3, HIDDEN_DIMS[1], EMBEDDING_DIM)

    def bn(n):
        return (jnp.ones((1, n), jnp.float32),    # gamma
                jnp.zeros((1, n), jnp.float32),   # beta
                jnp.zeros((1, n), jnp.float32),   # running_mean
                jnp.ones((1, n), jnp.float32))    # running_var

    g1, be1, m1, v1 = bn(HIDDEN_DIMS[0])
    g2, be2, m2, v2 = bn(HIDDEN_DIMS[1])

    return dict(w1=w1, b1=b1, g1=g1, be1=be1, m1=m1, v1=v1,
                w2=w2, b2=b2, g2=g2, be2=be2, m2=m2, v2=v2,
                w3=w3, b3=b3)


def reference_forward(x, p):
    """Pure-JAX f32 reference matching PyTorch eval() semantics."""
    h = jnp.maximum(x @ p["w1"] + p["b1"], 0.0)
    h = (h - p["m1"]) * jax.lax.rsqrt(p["v1"] + BN_EPS) * p["g1"] + p["be1"]
    h = jnp.maximum(h @ p["w2"] + p["b2"], 0.0)
    h = (h - p["m2"]) * jax.lax.rsqrt(p["v2"] + BN_EPS) * p["g2"] + p["be2"]
    return h @ p["w3"] + p["b3"]


if __name__ == "__main__":
    key = jax.random.PRNGKey(0)
    kx, kp = jax.random.split(key)

    batch = 8
    x = jax.random.normal(kx, (batch, INPUT_DIM), jnp.float32)
    params = init_params(kp)

    out = patient_embedding_forward(x, params)
    out = jax.block_until_ready(out)

    ref = reference_forward(x, params)
    assert out.shape == (batch, EMBEDDING_DIM)
    # bf16 weights/activations (f32 accumulate) -> looser tolerance than pure f32.
    assert jnp.allclose(out, ref, atol=2e-2, rtol=2e-2), (
        float(jnp.max(jnp.abs(out - ref))))

    print("KERNEL_OK")
</pallas_src>

<mosaic_0001>
module attributes {stable_mosaic.version = 11 : i64} {
  func.func @_mlp_kernel(%arg0: i32, %arg1: memref<8x20xf32, #tpu.memory_space<vmem>>, %arg2: memref<20x256xbf16, #tpu.memory_space<vmem>>, %arg3: memref<1x256xf32, #tpu.memory_space<vmem>>, %arg4: memref<256x128xbf16, #tpu.memory_space<vmem>>, %arg5: memref<1x128xf32, #tpu.memory_space<vmem>>, %arg6: memref<128x128xbf16, #tpu.memory_space<vmem>>, %arg7: memref<1x128xf32, #tpu.memory_space<vmem>>, %arg8: memref<8x128xf32, #tpu.memory_space<vmem>>) attributes {dimension_semantics = [#tpu.dimension_semantics<parallel>], iteration_bounds = array<i64: 1>, scalar_prefetch = 0 : i64, scratch_operands = 0 : i64, tpu.core_type = #tpu.core_type<tc>, window_params = [{transform_indices = @transform_0, window_bounds = array<i64: 8, 20>}, {pipeline_mode = #tpu.pipeline_mode<synchronous>, transform_indices = @transform_1, window_bounds = array<i64: 20, 256>}, {pipeline_mode = #tpu.pipeline_mode<synchronous>, transform_indices = @transform_2, window_bounds = array<i64: 1, 256>}, {pipeline_mode = #tpu.pipeline_mode<synchronous>, transform_indices = @transform_3, window_bounds = array<i64: 256, 128>}, {pipeline_mode = #tpu.pipeline_mode<synchronous>, transform_indices = @transform_4, window_bounds = array<i64: 1, 128>}, {pipeline_mode = #tpu.pipeline_mode<synchronous>, transform_indices = @transform_5, window_bounds = array<i64: 128, 128>}, {pipeline_mode = #tpu.pipeline_mode<synchronous>, transform_indices = @transform_6, window_bounds = array<i64: 1, 128>}, {transform_indices = @transform_7, window_bounds = array<i64: 8, 128>}]} {
    %c0 = arith.constant 0 : index
    %c0_0 = arith.constant 0 : index
    %0 = vector.load %arg1[%c0, %c0_0] : memref<8x20xf32, #tpu.memory_space<vmem>>, vector<8x20xf32>
    %1 = arith.truncf %0 : vector<8x20xf32> to vector<8x20xbf16>
    %c0_1 = arith.constant 0 : index
    %c0_2 = arith.constant 0 : index
    %2 = vector.load %arg2[%c0_1, %c0_2] : memref<20x256xbf16, #tpu.memory_space<vmem>>, vector<20x256xbf16>
    %cst = arith.constant dense<0.000000e+00> : vector<8x256xf32>
    %3 = tpu.matmul %1, %2, %cst {dimension_numbers = #tpu.dot_dimension_numbers<[1], [0], [0], [1], [0, 0, 1, 1], [], []>} : vector<8x20xbf16>, vector<20x256xbf16>, vector<8x256xf32> -> vector<8x256xf32>
    %c0_3 = arith.constant 0 : index
    %c0_4 = arith.constant 0 : index
    %4 = vector.load %arg3[%c0_3, %c0_4] : memref<1x256xf32, #tpu.memory_space<vmem>>, vector<1x256xf32>
    %5 = vector.broadcast %4 : vector<1x256xf32> to vector<8x256xf32>
    %6 = arith.addf %3, %5 : vector<8x256xf32>
    %cst_5 = arith.constant 0.000000e+00 : f32
    %7 = vector.broadcast %cst_5 : f32 to vector<8x256xf32>
    %8 = arith.maximumf %6, %7 : vector<8x256xf32>
    %9 = arith.truncf %8 : vector<8x256xf32> to vector<8x256xbf16>
    %c0_6 = arith.constant 0 : index
    %c0_7 = arith.constant 0 : index
    %10 = vector.load %arg4[%c0_6, %c0_7] : memref<256x128xbf16, #tpu.memory_space<vmem>>, vector<256x128xbf16>
    %cst_8 = arith.constant dense<0.000000e+00> : vector<8x128xf32>
    %11 = tpu.matmul %9, %10, %cst_8 {dimension_numbers = #tpu.dot_dimension_numbers<[1], [0], [0], [1], [0, 0, 1, 1], [], []>} : vector<8x256xbf16>, vector<256x128xbf16>, vector<8x128xf32> -> vector<8x128xf32>
    %c0_9 = arith.constant 0 : index
    %c0_10 = arith.constant 0 : index
    %12 = vector.load %arg5[%c0_9, %c0_10] : memref<1x128xf32, #tpu.memory_space<vmem>>, vector<1x128xf32>
    %13 = vector.broadcast %12 : vector<1x128xf32> to vector<8x128xf32>
    %14 = arith.addf %11, %13 : vector<8x128xf32>
    %cst_11 = arith.constant 0.000000e+00 : f32
    %15 = vector.broadcast %cst_11 : f32 to vector<8x128xf32>
    %16 = arith.maximumf %14, %15 : vector<8x128xf32>
    %17 = arith.truncf %16 : vector<8x128xf32> to vector<8x128xbf16>
    %c0_12 = arith.constant 0 : index
    %c0_13 = arith.constant 0 : index
    %18 = vector.load %arg6[%c0_12, %c0_13] : memref<128x128xbf16, #tpu.memory_space<vmem>>, vector<128x128xbf16>
    %cst_14 = arith.constant dense<0.000000e+00> : vector<8x128xf32>
    %19 = tpu.matmul %17, %18, %cst_14 {dimension_numbers = #tpu.dot_dimension_numbers<[1], [0], [0], [1], [0, 0, 1, 1], [], []>} : vector<8x128xbf16>, vector<128x128xbf16>, vector<8x128xf32> -> vector<8x128xf32>
    %c0_15 = arith.constant 0 : index
    %c0_16 = arith.constant 0 : index
    %20 = vector.load %arg7[%c0_15, %c0_16] : memref<1x128xf32, #tpu.memory_space<vmem>>, vector<1x128xf32>
    %21 = vector.broadcast %20 : vector<1x128xf32> to vector<8x128xf32>
    %22 = arith.addf %19, %21 : vector<8x128xf32>
    %c0_17 = arith.constant 0 : index
    %c0_18 = arith.constant 0 : index
    %23 = vector.load %arg8[%c0_17, %c0_18] : memref<8x128xf32, #tpu.memory_space<vmem>>, vector<8x128xf32>
    tpu.vector_store %arg8[%c0_17, %c0_18], %22 {strides = array<i32>} : memref<8x128xf32, #tpu.memory_space<vmem>>, vector<8x128xf32>,
    return
  }
  func.func @transform_0(%arg0: i32) -> (i32, i32) {
    %c0_i32 = arith.constant 0 : i32
    %c0_i32_0 = arith.constant 0 : i32
    return %arg0, %c0_i32 : i32, i32
  }
  func.func @transform_1(%arg0: i32) -> (i32, i32) {
    %c0_i32 = arith.constant 0 : i32
    %c0_i32_0 = arith.constant 0 : i32
    %c0_i32_1 = arith.constant 0 : i32
    return %c0_i32, %c0_i32_0 : i32, i32
  }
  func.func @transform_2(%arg0: i32) -> (i32, i32) {
    %c0_i32 = arith.constant 0 : i32
    %c0_i32_0 = arith.constant 0 : i32
    %c0_i32_1 = arith.constant 0 : i32
    return %c0_i32, %c0_i32_0 : i32, i32
  }
  func.func @transform_3(%arg0: i32) -> (i32, i32) {
    %c0_i32 = arith.constant 0 : i32
    %c0_i32_0 = arith.constant 0 : i32
    %c0_i32_1 = arith.constant 0 : i32
    return %c0_i32, %c0_i32_0 : i32, i32
  }
  func.func @transform_4(%arg0: i32) -> (i32, i32) {
    %c0_i32 = arith.constant 0 : i32
    %c0_i32_0 = arith.constant 0 : i32
    %c0_i32_1 = arith.constant 0 : i32
    return %c0_i32, %c0_i32_0 : i32, i32
  }
  func.func @transform_5(%arg0: i32) -> (i32, i32) {
    %c0_i32 = arith.constant 0 : i32
    %c0_i32_0 = arith.constant 0 : i32
    %c0_i32_1 = arith.constant 0 : i32
    return %c0_i32, %c0_i32_0 : i32, i32
  }
  func.func @transform_6(%arg0: i32) -> (i32, i32) {
    %c0_i32 = arith.constant 0 : i32
    %c0_i32_0 = arith.constant 0 : i32
    %c0_i32_1 = arith.constant 0 : i32
    return %c0_i32, %c0_i32_0 : i32, i32
  }
  func.func @transform_7(%arg0: i32) -> (i32, i32) {
    %c0_i32 = arith.constant 0 : i32
    %c0_i32_0 = arith.constant 0 : i32
    return %arg0, %c0_i32 : i32, i32
  }
}

</mosaic_0001>

<bundles_post_ra>
// kernel: patient_embedding_forward.1
= control target key start
LH: loop header
LB: loop body
LE: loop exit
PB: predicated region body
PF: predicated region fallthrough
CT: control target
= control target key end

     0   :  { %vm64_vm0 = vcmask 1041408   ;;  %v559_v3 = vmov 0   ;;  %vm60_vm1 = vcmask 162816   ;;  %s708_s0 = inlined_call_operand.vmem [shape: f32[8,20], index: 0, kind: input, shape index: {}]   ;;  %s709_s1 = inlined_call_operand.vmem [shape: bf16[20,256], index: 1, kind: input, shape index: {}]   ;;  %s710_s2 = inlined_call_operand.vmem [shape: f32[1,256], index: 2, kind: input, shape index: {}]   ;;  %s711_s3 = inlined_call_operand.vmem [shape: bf16[256,128], index: 3, kind: input, shape index: {}]   ;;  %s712_s4 = inlined_call_operand.vmem [shape: f32[1,128], index: 4, kind: input, shape index: {}]   ;;  %s713_s5 = inlined_call_operand.vmem [shape: bf16[128,128], index: 5, kind: input, shape index: {}]   ;;  %s714_s6 = inlined_call_operand.vmem [shape: f32[1,128], index: 6, kind: input, shape index: {}]   ;;  %s715_s7 = inlined_call_operand.hbm [shape: f32[8,128], index: 7, kind: output, shape index: {}]  }
   0x1   :  { %v506_v0 = vld [vmem:[%s709_s1 + $0x4] ss:$8 sps:$4 sm:$0xff]   ;;  %v508_v1 = vld [vmem:[%s709_s1] ss:$8 sps:$4 sm:$0xff]   ;;  %v32_v2 = vld [vmem:[%s709_s1 + $0x10] sm:$0x33]  ;;  %103 = vmatprep.mubr.bf16.mxu0 %v559_v3 }
   0x2   :  { %v28_v4 = vld [vmem:[%s708_s0] sm:$0xff]  ;;  %71 = vmatprep.subr.bf16.mxu0 %v506_v0  ;;  %v422_v5 = vcombine.high %v32_v2, %v32_v2  ;;  %v421_v6 = vcombine.low %v32_v2, %v32_v2  ;;  %v513_v10 = vld [vmem:[%s711_s3 + $0x48] sm:$0xff]   ;;  %v515_v13 = vld [vmem:[%s711_s3 + $0x50] sm:$0xff]  }
   0x3   :  { %v511_v7 = vld [vmem:[%s711_s3 + $0x40] sm:$0xff]   ;;  %72 = vmatpush1.bf16.msra.mxu0 %v508_v1  ;;  %v514_v11 = vld [vmem:[%s711_s3 + $0x8] sm:$0xff]   ;;  %v29_v12 = vpack.c.bf16 %v28_v4, %v28_v4  ;;  %v516_v14 = vld [vmem:[%s711_s3 + $0x10] sm:$0xff]  }
   0x4   :  { %v512_v8 = vld [vmem:[%s711_s3] sm:$0xff]   ;;  %423 = vmatprep.subr.msk.bf16.mxu0 %vm64_vm0, %v422_v5  ;;  %v66_v9 = vsel %vm64_vm0, %v421_v6, 0  ;;  %451 = vmatprep.subr.bf16.mxu1 %v511_v7  ;;  %v517_v15 = vld [vmem:[%s711_s3 + $0x58] sm:$0xff]   ;;  %v521_v19 = vld [vmem:[%s711_s3 + $0x68] sm:$0xff]  }
   0x5   :  { %452 = vmatpush3.bf16.msra.mxu1 %v512_v8  ;;  %v518_v16 = vld [vmem:[%s711_s3 + $0x18] sm:$0xff]   ;;  %v519_v17 = vld [vmem:[%s711_s3 + $0x60] sm:$0xff]   ;;  %v522_v20 = vld [vmem:[%s711_s3 + $0x28] sm:$0xff]  }
   0x6   :  { %453 = vmatprep.subr.bf16.mxu1 %v513_v10  ;;  %v520_v18 = vld [vmem:[%s711_s3 + $0x20] sm:$0xff]  }
   0x7   :  { %74 = vmatpush1.bf16.msra.mxu0 %v66_v9 }
   0x9   :  { %454 = vmatpush3.bf16.msra.mxu1 %v514_v11 }
   0xa   :  { %424 = vmatmul.mubr.msk.bf16.vlgmr.msra.gmra.mrb[0].mxu0 %vm60_vm1, %v29_v12  ;;  %455 = vmatprep.subr.bf16.mxu1 %v515_v13 }
   0xd   :  { %456 = vmatpush3.bf16.msra.mxu1 %v516_v14 }
   0xe   :  { %457 = vmatprep.subr.bf16.mxu1 %v517_v15 }
  0x11   :  { %458 = vmatpush3.bf16.msra.mxu1 %v518_v16 }
  0x12   :  { %459 = vmatprep.subr.bf16.mxu1 %v519_v17 }
  0x15   :  { %460 = vmatpush3.bf16.msra.mxu1 %v520_v18 }
  0x16   :  { %461 = vmatprep.subr.bf16.mxu1 %v521_v19 }
  0x17   :  { %12 = vsyncpa [#allocation3], 0  ;;  %v523_v21 = vld [vmem:[%s711_s3 + $0x70] sm:$0xff]   ;;  %v525_v23 = vld [vmem:[%s711_s3 + $0x78] sm:$0xff]   ;;  %v560_v26 = vmov 0.0   ;;  %v35_v32 = vlaneseq  ;;  %vm561_vm2 = vmmov 0  }
  0x18   :  { %v524_v22 = vld [vmem:[%s711_s3 + $0x30] sm:$0xff]   ;;  %v526_v24 = vld [vmem:[%s711_s3 + $0x38] sm:$0xff]   ;;  %v527_v25 = vld [vmem:[%s713_s5] sm:$0xff]   ;;  %482 = vmatprep.subr.bf16.mxu0 %v560_v26  ;;  %498 = vmatprep.mubr.msk.bf16.mxu0 %vm561_vm2, %v560_v26 }
  0x19   :  { %462 = vmatpush3.bf16.msra.mxu1 %v522_v20  ;;  %483 = vmatpush3.bf16.msra.mxu0 %v527_v25  ;;  %v528_v27 = vld [vmem:[%s713_s5 + $0x8] sm:$0xff]   ;;  %v529_v28 = vld [vmem:[%s713_s5 + $0x10] sm:$0xff]   ;;  %v530_v29 = vld [vmem:[%s713_s5 + $0x18] sm:$0xff]   ;;  %v36_v33 = vshrl.u32 %v35_v32, 7 }
  0x1a   :  { %463 = vmatprep.subr.bf16.mxu1 %v523_v21  ;;  %484 = vmatprep.subr.bf16.mxu0 %v560_v26  ;;  %v531_v30 = vld [vmem:[%s713_s5 + $0x20] sm:$0xff]   ;;  %v532_v31 = vld [vmem:[%s713_s5 + $0x28] sm:$0xff]   ;;  %v533_v49 = vld [vmem:[%s713_s5 + $0x30] sm:$0xff]  }
  0x1b   :  { %v37_v34 = vsub.s32 0, %v36_v33  ;;  %v33_v35 = vld [vmem:[%s710_s2] sm:$0x3]  ;;  %v41_v36 = vsub.s32 1, %v36_v33  ;;  %v534_v50 = vld [vmem:[%s713_s5 + $0x38] sm:$0xff]   ;;  %s562_s5 = smov [#allocation2]  }
  0x1c   :  { %v425_v52 = vld [vmem:[%s712_s4] ss:$0 sm:$0xff]  ;;  %s411_s11 = sshll.u32 %s562_s5, 4  ;;  %s412_s11 = int_to_ptr.vmem [resolvable:$true] %s411_s11 }
  0x1d   :  { %464 = vmatpush3.bf16.msra.mxu1 %v524_v22  ;;  %485 = vmatpush3.bf16.msra.mxu0 %v528_v27  ;;  %v38_v37 = vrot.slane %v33_v35, %v37_v34  ;;  %v42_v38 = vrot.slane %v33_v35, %v41_v36  ;;  %v442_v60 = vld [vmem:[%s714_s6] ss:$0 sm:$0xff]  ;;  %s535_s4 = scalar_lea.vmem %s412_s11, 128  ;;  %p540_p1 = scmp.lt.s32.totalorder %s412_s11, %s412_s11 }
  0x1e   :  { %465 = vmatprep.subr.bf16.mxu1 %v525_v23  ;;  %486 = vmatprep.subr.bf16.mxu0 %v560_v26  ;;  %p536_p0 = scmp.ne.s32.totalorder %s412_s11, %s535_s4  ;;  %p541_p2 = scmp.lt.s32.totalorder %s535_s4, %s535_s4 }
  0x20   :  { %p542_p3 = por %p541_p2, %p540_p1 }
  0x21   :  { %466 = vmatpush3.bf16.msra.mxu1 %v526_v24  ;;  %487 = vmatpush3.bf16.msra.mxu0 %v529_v28 }
  0x22   :  { %488 = vmatprep.subr.bf16.mxu0 %v560_v26  ;;  %p543_p4 = pnand %p542_p3, %p536_p0 }
  0x25   :  { %489 = vmatpush3.bf16.msra.mxu0 %v530_v29 }
  0x26   :  { %490 = vmatprep.subr.bf16.mxu0 %v560_v26 }
  0x29   :  { %491 = vmatpush3.bf16.msra.mxu0 %v531_v30 }
  0x2a   :  { %492 = vmatprep.subr.bf16.mxu0 %v560_v26 }
  0x2d   :  { %493 = vmatpush3.bf16.msra.mxu0 %v532_v31 }
  0x2e   :  { %494 = vmatprep.subr.bf16.mxu0 %v560_v26 }
  0x31   :  { %495 = vmatpush3.bf16.msra.mxu0 %v533_v49 }
  0x32   :  { %496 = vmatprep.subr.bf16.mxu0 %v560_v26 }
  0x35   :  { %497 = vmatpush3.bf16.msra.mxu0 %v534_v50 }
  0xdd   :  { %v105_v39 = vpop.f32.mrb[0].mxu0 }
  0xde   :  { %v106_v40 = vadd.f32 %v105_v39, %v38_v37  ;;  %v107_v41 = vpop.f32.mrb[1].mxu0 }
  0xdf   :  { %v108_v42 = vadd.f32 %v107_v41, %v42_v38  ;;  %v109_v43 = vpop.f32.mrb[2].mxu0 }
  0xe0   :  { %v112_v44 = vmax.f32 %v106_v40, 0.0  ;;  %v110_v45 = vpop.f32.mrb[3].mxu0 }
  0xe1   :  { %v113_v46 = vmax.f32 %v108_v42, 0.0 }
  0xe2   :  { %v114_v48 = vpack.c.bf16 %v112_v44, %v112_v44 }
  0xe3   :  { %v115_v47 = vpack.c.bf16 %v113_v46, %v113_v46 }
  0xe5   :  { %283 = vmatprep.mubr.bf16.mxu1 %v115_v47 }
  0xe6   :  { %284 = vmatmul.mubr.bf16.vlgmr.msra.gmra.mrb[0].mxu1 %v114_v48 }
 0x1b9   :  { %v467_v51 = vpop.f32.mrb[0].mxu1 }
 0x1ba   :  { %v468_v53 = vpop.f32.mrb[1].mxu1 }
 0x1bb   :  { %v469_v54 = vadd.f32 %v468_v53, %v467_v51  ;;  %v470_v55 = vpop.f32.mrb[2].mxu1 }
 0x1bc   :  { %v471_v56 = vpop.f32.mrb[3].mxu1 }
 0x1bd   :  { %v286_v57 = vadd.f32 %v469_v54, %v425_v52 }
 0x1bf   :  { %v291_v58 = vmax.f32 %v286_v57, 0.0 }
 0x1c1   :  { %v292_v59 = vpack.c.bf16 %v291_v58, %v291_v58 }
 0x1c3   :  { %499 = vmatmul.mubr.bf16.vlgmr.msra.gmra.mrb[4].mxu0 %v292_v59 }
 0x296   :  { %v398_v61 = vpop.f32.mrb[4].mxu0 }
 0x297   :  { %v399_v62 = vadd.f32 %v442_v60, %v398_v61  ;;  %v500_v63 = vpop.f32.mrb[5].mxu0 }
 0x298   :  { %v401_v0 = vpop.f32.mrb[6].mxu0 }
 0x299   :  { %404 = vst [vmem:[#allocation2] sm:$0xff] %v399_v62  ;;  %v501_v1 = vpop.f32.mrb[7].mxu0 }
 0x29a   :  { %546 = shalt.err (!%p543_p4)
}
 0x29b   :  { %s547_s6 = scalar_lea.hbm %s715_s7, 128 }
 0x29c   :  { %p548_p5 = scmp.ne.s32.totalorder %s715_s7, %s547_s6  ;;  %p551_p6 = scmp.lt.u32.totalorder %s547_s6, %s715_s7 }
 0x29e   :  { %p553_p7 = pnand %p551_p6, %p548_p5 }
 0x2a0   :  { %556 = shalt.err (!%p553_p7)
}
 0x2a1   :  { %414 = dma.vmem_to_hbm [thread:$0]  %s412_s11, 128, %s715_s7, [#allocation3]  }
 0x2a2   :  { %557 = dma.done.wait [#allocation3], 128  }
 0x2a3   :  { %558 = vsyncadd [#allocation3], 4294967168 }
 0x2a4   :  { %418 = vsyncpa [#allocation3], 1 }

</bundles_post_ra>
